<compile_context>
chip_gen: v7x
topology: tpu7x:2x2x1
jax: 0.10.0
libtpu: 0.0.40
codegen_flags: <defaults>
</compile_context>

<pallas_src>
import functools

import jax
import jax.numpy as jnp
from jax.experimental import pallas as pl
from jax.experimental.pallas import tpu as pltpu


def _quantize_rows_f32(x):
    """Row-wise absmax 'int8' quantization; values kept as exact floats."""
    ax = jnp.max(jnp.abs(x), axis=-1, keepdims=True)
    ax = jnp.where(ax == 0.0, 1.0, ax)          # bnb-style all-zero-row guard
    xq = jnp.clip(jnp.round(x * (127.0 / ax)), -127.0, 127.0)
    return xq, ax


def _mlp8bit_kernel(x_ref, w1q_ref, s1_ref, b1_ref, w2q_ref, s2_ref, b2_ref,
                    o_ref):
    """Fused MLP8bit forward for one batch tile.

    fc1: quantize x rows -> bf16 'int8' matmul with pre-quantized W1 -> dequant + b1
    fc2: same on the intermediate h (stays on-chip, never written to HBM).
    """
    x = x_ref[...].astype(jnp.float32)                       # [tm, dim1]

    # ---------------- fc1 ----------------
    xq, ax = _quantize_rows_f32(x)
    acc1 = jax.lax.dot_general(
        xq.astype(jnp.bfloat16), w1q_ref[...],               # [tm,d1] x [d2,d1]
        dimension_numbers=(((1,), (1,)), ((), ())),
        preferred_element_type=jnp.float32,
    )                                                        # [tm, dim2]
    h = acc1 * (ax * (1.0 / 127.0)) * s1_ref[...] + b1_ref[...]

    # ---------------- fc2 ----------------
    hq, ah = _quantize_rows_f32(h)
    acc2 = jax.lax.dot_general(
        hq.astype(jnp.bfloat16), w2q_ref[...],               # [tm,d2] x [d1,d2]
        dimension_numbers=(((1,), (1,)), ((), ())),
        preferred_element_type=jnp.float32,
    )                                                        # [tm, dim1]
    o_ref[...] = acc2 * (ah * (1.0 / 127.0)) * s2_ref[...] + b2_ref[...]


def prequantize_weight(w):
    """Per-output-row absmax quantization of W[out, in]; done once per model.

    Returns:
      wq   : bf16 [out, in]  (exact integer values in [-127, 127])
      scale: f32  [1, out]   (= absmax/127, already on the lane axis so the
                              kernel dequant is a pure VPU broadcast-multiply).
    """
    aw = jnp.max(jnp.abs(w), axis=-1, keepdims=True)
    aw = jnp.where(aw == 0.0, 1.0, aw)
    wq = jnp.clip(jnp.round(w * (127.0 / aw)), -127.0, 127.0)
    return wq.astype(jnp.bfloat16), (aw * (1.0 / 127.0)).reshape(1, -1)


@functools.partial(jax.jit, static_argnames=("tm",))
def mlp8bit_forward(x, params, tm=128):
    """MLP8bit.forward: fc1 (dim1->dim2) then fc2 (dim2->dim1), fused."""
    w1, b1, w2, b2 = params
    B, dim1 = x.shape
    dim2 = w1.shape[0]

    # Weight quantization hoisted out of the kernel (static across batch/grid);
    # bf16 storage halves weight HBM traffic vs f32.
    w1q, s1 = prequantize_weight(w1)
    w2q, s2 = prequantize_weight(w2)
    b1_2d = b1.reshape(1, dim2).astype(jnp.float32)
    b2_2d = b2.reshape(1, dim1).astype(jnp.float32)

    tm = min(tm, B)
    grid = (pl.cdiv(B, tm),)

    flops = 2 * B * dim1 * dim2 * 2          # two matmuls
    bytes_accessed = (B * dim1 * 4           # x in
                      + w1q.size * 2 + w2q.size * 2
                      + (s1.size + s2.size + b1.size + b2.size) * 4
                      + B * dim1 * 4)        # y out

    return pl.pallas_call(
        _mlp8bit_kernel,
        out_shape=jax.ShapeDtypeStruct((B, dim1), jnp.float32),
        grid=grid,
        in_specs=[
            pl.BlockSpec((tm, dim1), lambda i: (i, 0)),      # x tile
            pl.BlockSpec((dim2, dim1), lambda i: (0, 0)),    # W1q (whole)
            pl.BlockSpec((1, dim2), lambda i: (0, 0)),       # s1
            pl.BlockSpec((1, dim2), lambda i: (0, 0)),       # b1
            pl.BlockSpec((dim1, dim2), lambda i: (0, 0)),    # W2q (whole)
            pl.BlockSpec((1, dim1), lambda i: (0, 0)),       # s2
            pl.BlockSpec((1, dim1), lambda i: (0, 0)),       # b2
        ],
        out_specs=pl.BlockSpec((tm, dim1), lambda i: (i, 0)),
        compiler_params=pltpu.CompilerParams(
            dimension_semantics=("parallel",)),
        cost_estimate=pl.CostEstimate(
            flops=flops, transcendentals=0, bytes_accessed=bytes_accessed),
    )(x, w1q, s1, b1_2d, w2q, s2, b2_2d)


def _reference_forward(x, params):
    """Pure-JAX reference of the same simulated-int8 math (for validation)."""
    def layer(x, w, b):
        xq, ax = _quantize_rows_f32(x.astype(jnp.float32))
        wq, aw = _quantize_rows_f32(w.astype(jnp.float32))
        acc = jax.lax.dot_general(
            xq, wq, dimension_numbers=(((1,), (1,)), ((), ())),
            preferred_element_type=jnp.float32)
        return acc * (ax * (1.0 / 127.0)) * (aw.T * (1.0 / 127.0)) + b.reshape(1, -1)

    w1, b1, w2, b2 = params
    return layer(layer(x, w1, b1), w2, b2)


def init_params(key, dim1, dim2):
    """Deterministic Linear-like init (uniform +/- 1/sqrt(fan_in))."""
    k1, k2, k3, k4 = jax.random.split(key, 4)
    lim1 = 1.0 / (dim1 ** 0.5)
    lim2 = 1.0 / (dim2 ** 0.5)
    w1 = jax.random.uniform(k1, (dim2, dim1), jnp.float32, -lim1, lim1)
    b1 = jax.random.uniform(k2, (dim2,), jnp.float32, -lim1, lim1)
    w2 = jax.random.uniform(k3, (dim1, dim2), jnp.float32, -lim2, lim2)
    b2 = jax.random.uniform(k4, (dim1,), jnp.float32, -lim2, lim2)
    return (w1, b1, w2, b2)


if __name__ == "__main__":
    dim1, dim2, batch = 32, 64, 8
    key = jax.random.PRNGKey(0)
    kx, kp = jax.random.split(key)
    x = jax.random.normal(kx, (batch, dim1), jnp.float32)
    params = init_params(kp, dim1, dim2)

    y = mlp8bit_forward(x, params)
    jax.block_until_ready(y)
    assert y.shape == (batch, dim1), y.shape

    y_ref = _reference_forward(x, params)
    assert jnp.allclose(y, y_ref, rtol=1e-4, atol=1e-4), (
        float(jnp.max(jnp.abs(y - y_ref))))

    print("KERNEL_OK")
</pallas_src>

<mosaic_0001>
module attributes {stable_mosaic.version = 11 : i64} {
  func.func @_mlp8bit_kernel(%arg0: i32, %arg1: memref<8x32xf32, #tpu.memory_space<vmem>>, %arg2: memref<64x32xbf16, #tpu.memory_space<vmem>>, %arg3: memref<1x64xf32, #tpu.memory_space<vmem>>, %arg4: memref<1x64xf32, #tpu.memory_space<vmem>>, %arg5: memref<32x64xbf16, #tpu.memory_space<vmem>>, %arg6: memref<1x32xf32, #tpu.memory_space<vmem>>, %arg7: memref<1x32xf32, #tpu.memory_space<vmem>>, %arg8: memref<8x32xf32, #tpu.memory_space<vmem>>) attributes {dimension_semantics = [#tpu.dimension_semantics<parallel>], iteration_bounds = array<i64: 1>, scalar_prefetch = 0 : i64, scratch_operands = 0 : i64, tpu.core_type = #tpu.core_type<tc>, window_params = [{transform_indices = @transform_0, window_bounds = array<i64: 8, 32>}, {pipeline_mode = #tpu.pipeline_mode<synchronous>, transform_indices = @transform_1, window_bounds = array<i64: 64, 32>}, {pipeline_mode = #tpu.pipeline_mode<synchronous>, transform_indices = @transform_2, window_bounds = array<i64: 1, 64>}, {pipeline_mode = #tpu.pipeline_mode<synchronous>, transform_indices = @transform_3, window_bounds = array<i64: 1, 64>}, {pipeline_mode = #tpu.pipeline_mode<synchronous>, transform_indices = @transform_4, window_bounds = array<i64: 32, 64>}, {pipeline_mode = #tpu.pipeline_mode<synchronous>, transform_indices = @transform_5, window_bounds = array<i64: 1, 32>}, {pipeline_mode = #tpu.pipeline_mode<synchronous>, transform_indices = @transform_6, window_bounds = array<i64: 1, 32>}, {transform_indices = @transform_7, window_bounds = array<i64: 8, 32>}]} {
    %c0 = arith.constant 0 : index
    %c0_0 = arith.constant 0 : index
    %0 = vector.load %arg1[%c0, %c0_0] : memref<8x32xf32, #tpu.memory_space<vmem>>, vector<8x32xf32>
    %1 = math.absf %0 : vector<8x32xf32>
    %cst = arith.constant dense<0xFF800000> : vector<8xf32>
    %2 = vector.multi_reduction <maximumf>, %1, %cst [1] : vector<8x32xf32> to vector<8xf32>
    %3 = vector.shape_cast %2 : vector<8xf32> to vector<8x1xf32>
    %cst_1 = arith.constant 0.000000e+00 : f32
    %4 = vector.broadcast %cst_1 : f32 to vector<8x1xf32>
    %5 = arith.cmpf oeq, %3, %4 : vector<8x1xf32>
    %cst_2 = arith.constant 1.000000e+00 : f32
    %6 = vector.broadcast %cst_2 : f32 to vector<8x1xf32>
    %7 = arith.select %5, %6, %3 : vector<8x1xi1>, vector<8x1xf32>
    %cst_3 = arith.constant 1.270000e+02 : f32
    %8 = vector.broadcast %cst_3 : f32 to vector<8x1xf32>
    %9 = arith.divf %8, %7 : vector<8x1xf32>
    %10 = vector.broadcast %9 : vector<8x1xf32> to vector<8x32xf32>
    %11 = arith.mulf %0, %10 : vector<8x32xf32>
    %12 = math.roundeven %11 : vector<8x32xf32>
    %cst_4 = arith.constant -1.270000e+02 : f32
    %cst_5 = arith.constant 1.270000e+02 : f32
    %13 = vector.broadcast %cst_4 : f32 to vector<8x32xf32>
    %14 = arith.maximumf %13, %12 : vector<8x32xf32>
    %15 = vector.broadcast %cst_5 : f32 to vector<8x32xf32>
    %16 = arith.minimumf %15, %14 : vector<8x32xf32>
    %17 = arith.truncf %16 : vector<8x32xf32> to vector<8x32xbf16>
    %c0_6 = arith.constant 0 : index
    %c0_7 = arith.constant 0 : index
    %18 = vector.load %arg2[%c0_6, %c0_7] : memref<64x32xbf16, #tpu.memory_space<vmem>>, vector<64x32xbf16>
    %cst_8 = arith.constant dense<0.000000e+00> : vector<8x64xf32>
    %19 = tpu.matmul %17, %18, %cst_8 {dimension_numbers = #tpu.dot_dimension_numbers<[1], [1], [0], [0], [0, 0, 1, 0], [], []>} : vector<8x32xbf16>, vector<64x32xbf16>, vector<8x64xf32> -> vector<8x64xf32>
    %cst_9 = arith.constant 0.00787401571 : f32
    %20 = vector.broadcast %cst_9 : f32 to vector<8x1xf32>
    %21 = arith.mulf %7, %20 : vector<8x1xf32>
    %22 = vector.broadcast %21 : vector<8x1xf32> to vector<8x64xf32>
    %23 = arith.mulf %19, %22 : vector<8x64xf32>
    %c0_10 = arith.constant 0 : index
    %c0_11 = arith.constant 0 : index
    %24 = vector.load %arg3[%c0_10, %c0_11] : memref<1x64xf32, #tpu.memory_space<vmem>>, vector<1x64xf32>
    %25 = vector.broadcast %24 : vector<1x64xf32> to vector<8x64xf32>
    %26 = arith.mulf %23, %25 : vector<8x64xf32>
    %c0_12 = arith.constant 0 : index
    %c0_13 = arith.constant 0 : index
    %27 = vector.load %arg4[%c0_12, %c0_13] : memref<1x64xf32, #tpu.memory_space<vmem>>, vector<1x64xf32>
    %28 = vector.broadcast %27 : vector<1x64xf32> to vector<8x64xf32>
    %29 = arith.addf %26, %28 : vector<8x64xf32>
    %30 = math.absf %29 : vector<8x64xf32>
    %cst_14 = arith.constant dense<0xFF800000> : vector<8xf32>
    %31 = vector.multi_reduction <maximumf>, %30, %cst_14 [1] : vector<8x64xf32> to vector<8xf32>
    %32 = vector.shape_cast %31 : vector<8xf32> to vector<8x1xf32>
    %cst_15 = arith.constant 0.000000e+00 : f32
    %33 = vector.broadcast %cst_15 : f32 to vector<8x1xf32>
    %34 = arith.cmpf oeq, %32, %33 : vector<8x1xf32>
    %cst_16 = arith.constant 1.000000e+00 : f32
    %35 = vector.broadcast %cst_16 : f32 to vector<8x1xf32>
    %36 = arith.select %34, %35, %32 : vector<8x1xi1>, vector<8x1xf32>
    %cst_17 = arith.constant 1.270000e+02 : f32
    %37 = vector.broadcast %cst_17 : f32 to vector<8x1xf32>
    %38 = arith.divf %37, %36 : vector<8x1xf32>
    %39 = vector.broadcast %38 : vector<8x1xf32> to vector<8x64xf32>
    %40 = arith.mulf %29, %39 : vector<8x64xf32>
    %41 = math.roundeven %40 : vector<8x64xf32>
    %cst_18 = arith.constant -1.270000e+02 : f32
    %cst_19 = arith.constant 1.270000e+02 : f32
    %42 = vector.broadcast %cst_18 : f32 to vector<8x64xf32>
    %43 = arith.maximumf %42, %41 : vector<8x64xf32>
    %44 = vector.broadcast %cst_19 : f32 to vector<8x64xf32>
    %45 = arith.minimumf %44, %43 : vector<8x64xf32>
    %46 = arith.truncf %45 : vector<8x64xf32> to vector<8x64xbf16>
    %c0_20 = arith.constant 0 : index
    %c0_21 = arith.constant 0 : index
    %47 = vector.load %arg5[%c0_20, %c0_21] : memref<32x64xbf16, #tpu.memory_space<vmem>>, vector<32x64xbf16>
    %cst_22 = arith.constant dense<0.000000e+00> : vector<8x32xf32>
    %48 = tpu.matmul %46, %47, %cst_22 {dimension_numbers = #tpu.dot_dimension_numbers<[1], [1], [0], [0], [0, 0, 1, 0], [], []>} : vector<8x64xbf16>, vector<32x64xbf16>, vector<8x32xf32> -> vector<8x32xf32>
    %cst_23 = arith.constant 0.00787401571 : f32
    %49 = vector.broadcast %cst_23 : f32 to vector<8x1xf32>
    %50 = arith.mulf %36, %49 : vector<8x1xf32>
    %51 = vector.broadcast %50 : vector<8x1xf32> to vector<8x32xf32>
    %52 = arith.mulf %48, %51 : vector<8x32xf32>
    %c0_24 = arith.constant 0 : index
    %c0_25 = arith.constant 0 : index
    %53 = vector.load %arg6[%c0_24, %c0_25] : memref<1x32xf32, #tpu.memory_space<vmem>>, vector<1x32xf32>
    %54 = vector.broadcast %53 : vector<1x32xf32> to vector<8x32xf32>
    %55 = arith.mulf %52, %54 : vector<8x32xf32>
    %c0_26 = arith.constant 0 : index
    %c0_27 = arith.constant 0 : index
    %56 = vector.load %arg7[%c0_26, %c0_27] : memref<1x32xf32, #tpu.memory_space<vmem>>, vector<1x32xf32>
    %57 = vector.broadcast %56 : vector<1x32xf32> to vector<8x32xf32>
    %58 = arith.addf %55, %57 : vector<8x32xf32>
    %c0_28 = arith.constant 0 : index
    %c0_29 = arith.constant 0 : index
    %59 = vector.load %arg8[%c0_28, %c0_29] : memref<8x32xf32, #tpu.memory_space<vmem>>, vector<8x32xf32>
    tpu.vector_store %arg8[%c0_28, %c0_29], %58 {strides = array<i32>} : memref<8x32xf32, #tpu.memory_space<vmem>>, vector<8x32xf32>,
    return
  }
  func.func @transform_0(%arg0: i32) -> (i32, i32) {
    %c0_i32 = arith.constant 0 : i32
    %c0_i32_0 = arith.constant 0 : i32
    return %arg0, %c0_i32 : i32, i32
  }
  func.func @transform_1(%arg0: i32) -> (i32, i32) {
    %c0_i32 = arith.constant 0 : i32
    %c0_i32_0 = arith.constant 0 : i32
    %c0_i32_1 = arith.constant 0 : i32
    return %c0_i32, %c0_i32_0 : i32, i32
  }
  func.func @transform_2(%arg0: i32) -> (i32, i32) {
    %c0_i32 = arith.constant 0 : i32
    %c0_i32_0 = arith.constant 0 : i32
    %c0_i32_1 = arith.constant 0 : i32
    return %c0_i32, %c0_i32_0 : i32, i32
  }
  func.func @transform_3(%arg0: i32) -> (i32, i32) {
    %c0_i32 = arith.constant 0 : i32
    %c0_i32_0 = arith.constant 0 : i32
    %c0_i32_1 = arith.constant 0 : i32
    return %c0_i32, %c0_i32_0 : i32, i32
  }
  func.func @transform_4(%arg0: i32) -> (i32, i32) {
    %c0_i32 = arith.constant 0 : i32
    %c0_i32_0 = arith.constant 0 : i32
    %c0_i32_1 = arith.constant 0 : i32
    return %c0_i32, %c0_i32_0 : i32, i32
  }
  func.func @transform_5(%arg0: i32) -> (i32, i32) {
    %c0_i32 = arith.constant 0 : i32
    %c0_i32_0 = arith.constant 0 : i32
    %c0_i32_1 = arith.constant 0 : i32
    return %c0_i32, %c0_i32_0 : i32, i32
  }
  func.func @transform_6(%arg0: i32) -> (i32, i32) {
    %c0_i32 = arith.constant 0 : i32
    %c0_i32_0 = arith.constant 0 : i32
    %c0_i32_1 = arith.constant 0 : i32
    return %c0_i32, %c0_i32_0 : i32, i32
  }
  func.func @transform_7(%arg0: i32) -> (i32, i32) {
    %c0_i32 = arith.constant 0 : i32
    %c0_i32_0 = arith.constant 0 : i32
    return %arg0, %c0_i32 : i32, i32
  }
}

</mosaic_0001>

<bundles_post_ra>
// kernel: mlp8bit_forward.1
= control target key start
LH: loop header
LB: loop body
LE: loop exit
PB: predicated region body
PF: predicated region fallthrough
CT: control target
= control target key end

     0   :  { %vm30_vm0 = vcmask 261120   ;;  %v335_v3 = vmov 0.0   ;;  %s434_s0 = inlined_call_operand.vmem [shape: f32[8,32], index: 0, kind: input, shape index: {}]   ;;  %s435_s1 = inlined_call_operand.vmem [shape: bf16[64,32], index: 1, kind: input, shape index: {}]   ;;  %s436_s2 = inlined_call_operand.vmem [shape: f32[1,64], index: 2, kind: input, shape index: {}]   ;;  %s437_s3 = inlined_call_operand.vmem [shape: f32[1,64], index: 3, kind: input, shape index: {}]   ;;  %s438_s4 = inlined_call_operand.vmem [shape: bf16[32,64], index: 4, kind: input, shape index: {}]   ;;  %s439_s5 = inlined_call_operand.vmem [shape: f32[1,32], index: 5, kind: input, shape index: {}]   ;;  %s440_s6 = inlined_call_operand.vmem [shape: f32[1,32], index: 6, kind: input, shape index: {}]   ;;  %s441_s7 = inlined_call_operand.hbm [shape: f32[8,32], index: 7, kind: output, shape index: {}]  }
   0x1   :  { %v28_v0 = vld [vmem:[%s434_s0] sm:$0xff]  ;;  %276 = vmatprep.subr.bf16.mxu0 %v335_v3  ;;  %288 = vmatprep.subr.bf16.mxu1 %v335_v3 }
   0x2   :  { %v301_v1 = vld [vmem:[%s435_s1] sm:$0xff]   ;;  %v29_v2 = vand.u32 2147483647, %v28_v0 }
   0x3   :  { %v75_v4 = vsel %vm30_vm0, %v301_v1, 0 }
   0x4   :  { %v31_v5 = vsel %vm30_vm0, %v29_v2, -inf  ;;  %277 = vmatpush3.bf16.xpose.msra.mxu0 %v75_v4 }
   0x5   :  { %32 = vmax.xlane.f32.xlu0 %v31_v5  ;;  %278 = vmatprep.subr.bf16.mxu0 %v335_v3 }
   0x6   :  { %12 = vsyncpa [#allocation3], 0  ;;  %v302_v6 = vld [vmem:[%s435_s1 + $0x8] sm:$0xff]   ;;  %v303_v8 = vld [vmem:[%s435_s1 + $0x10] sm:$0xff]   ;;  %vm336_vm1 = vmmov 0   ;;  %vm145_vm3 = vcmask 523264  }
   0x7   :  { %v78_v7 = vsel %vm30_vm0, %v302_v6, 0  ;;  %v81_v9 = vsel %vm30_vm0, %v303_v8, 0  ;;  %v304_v10 = vld [vmem:[%s435_s1 + $0x18] sm:$0xff]   ;;  %284 = vmatprep.mubr.msk.bf16.mxu0 %vm336_vm1, %v335_v3  ;;  %292 = vmatprep.mubr.msk.bf16.mxu1 %vm336_vm1, %v335_v3  ;;  %v260_v22 = vld [vmem:[%s436_s2] ss:$0 sm:$0xff]  ;;  %v306_v34 = vld [vmem:[%s438_s4 + $0x8] sm:$0xff]  }
   0x8   :  { %v84_v11 = vsel %vm30_vm0, %v304_v10, 0  ;;  %v261_v26 = vld [vmem:[%s437_s3] ss:$0 sm:$0xff]  ;;  %v179_v35 = vsel %vm145_vm3, %v306_v34, 0  ;;  %s337_s18 = smov [#allocation2]  }
   0x9   :  { %v305_v32 = vld [vmem:[%s438_s4] sm:$0xff]   ;;  %s246_s19 = sshll.u32 %s337_s18, 4  ;;  %s247_s19 = int_to_ptr.vmem [resolvable:$true] %s246_s19 }
   0xa   :  { %v176_v33 = vsel %vm145_vm3, %v305_v32, 0  ;;  %v266_v46 = vld [vmem:[%s439_s5] ss:$0 sm:$0xff]  ;;  %s311_s20 = scalar_lea.vmem %s247_s19, 128  ;;  %p316_p1 = scmp.lt.s32.totalorder %s247_s19, %s247_s19 }
   0xb   :  { %289 = vmatpush3.bf16.xpose.msra.mxu1 %v176_v33  ;;  %v267_v50 = vld [vmem:[%s440_s6] ss:$0 sm:$0xff]  ;;  %p312_p0 = scmp.ne.s32.totalorder %s247_s19, %s311_s20  ;;  %p317_p2 = scmp.lt.s32.totalorder %s311_s20, %s311_s20 }
   0xc   :  { %279 = vmatpush3.bf16.xpose.msra.mxu0 %v78_v7  ;;  %290 = vmatprep.subr.bf16.mxu1 %v335_v3 }
   0xd   :  { %280 = vmatprep.subr.bf16.mxu0 %v335_v3  ;;  %p318_p3 = por %p317_p2, %p316_p1 }
   0xf   :  { %p319_p4 = pnand %p318_p3, %p312_p0 }
  0x13   :  { %291 = vmatpush3.bf16.xpose.msra.mxu1 %v179_v35 }
  0x14   :  { %281 = vmatpush3.bf16.xpose.msra.mxu0 %v81_v9 }
  0x15   :  { %282 = vmatprep.subr.bf16.mxu0 %v335_v3 }
  0x1c   :  { %283 = vmatpush3.bf16.xpose.msra.mxu0 %v84_v11 }
  0x92   :  { %v33_v12 = vpop.xlane.xlu0 %32 }
  0x93   :  { %vm34_vm2 = vcmp.eq.f32.partialorder %v33_v12, 0.0 }
  0x94   :  { %v35_v13 = vsel %vm34_vm2, 1.0, %v33_v12 }
  0x95   :  { %307 = vrcp.f32 %v35_v13  ;;  %v126_v20 = vmul.f32 0.007874016, %v35_v13 }
  0x9f   :  { %v308_v14 = vpop.eup %307 }
  0xa0   :  { %v37_v15 = vmul.f32 127.0, %v308_v14 }
  0xa2   :  { %v38_v16 = vmul.f32 %v37_v15, %v28_v0 }
  0xa4   :  { %v296_v17 = vround.rtne.f32 %v38_v16 }
  0xa6   :  { %v254_v18 = vclamps-f32 %v296_v17, 127.0 }
  0xa8   :  { %v42_v19 = vpack.c.bf16 %v254_v18, %v254_v18 }
  0xaa   :  { %285 = vmatmul.mubr.msk.bf16.vlgmr.msra.gmra.mrb[0].mxu0 %vm30_vm0, %v42_v19 }
 0x17d   :  { %v120_v21 = vpop.f32.mrb[0].mxu0 }
 0x17e   :  { %v127_v23 = vmul.f32 %v126_v20, %v120_v21  ;;  %v286_v24 = vpop.f32.mrb[1].mxu0 }
 0x17f   :  { %v123_v25 = vpop.f32.mrb[2].mxu0 }
 0x180   :  { %v135_v27 = vmul.f32 %v260_v22, %v127_v23  ;;  %v287_v28 = vpop.f32.mrb[3].mxu0 }
 0x182   :  { %v143_v29 = vadd.f32 %v261_v26, %v135_v27 }
 0x184   :  { %v144_v30 = vand.u32 2147483647, %v143_v29 }
 0x186   :  { %v146_v31 = vsel %vm145_vm3, %v144_v30, -inf }
 0x187   :  { %147 = vmax.xlane.f32.xlu0 %v146_v31 }
 0x214   :  { %v148_v36 = vpop.xlane.xlu0 %147 }
 0x215   :  { %vm149_vm4 = vcmp.eq.f32.partialorder %v148_v36, 0.0 }
 0x216   :  { %v150_v37 = vsel %vm149_vm4, 1.0, %v148_v36 }
 0x217   :  { %309 = vrcp.f32 %v150_v37  ;;  %v221_v44 = vmul.f32 0.007874016, %v150_v37 }
 0x221   :  { %v310_v38 = vpop.eup %309 }
 0x222   :  { %v152_v39 = vmul.f32 127.0, %v310_v38 }
 0x224   :  { %v153_v40 = vmul.f32 %v152_v39, %v143_v29 }
 0x226   :  { %v297_v41 = vround.rtne.f32 %v153_v40 }
 0x228   :  { %v262_v42 = vclamps-f32 %v297_v41, 127.0 }
 0x22a   :  { %v157_v43 = vpack.c.bf16 %v262_v42, %v262_v42 }
 0x22c   :  { %293 = vmatmul.mubr.msk.bf16.vlgmr.msra.gmra.mrb[0].mxu1 %vm145_vm3, %v157_v43 }
 0x2ff   :  { %v215_v45 = vpop.f32.mrb[0].mxu1 }
 0x300   :  { %v222_v47 = vmul.f32 %v221_v44, %v215_v45  ;;  %v294_v48 = vpop.f32.mrb[1].mxu1 }
 0x301   :  { %v218_v49 = vpop.f32.mrb[2].mxu1 }
 0x302   :  { %v230_v51 = vmul.f32 %v266_v46, %v222_v47  ;;  %v295_v52 = vpop.f32.mrb[3].mxu1 }
 0x304   :  { %v238_v53 = vadd.f32 %v267_v50, %v230_v51 }
 0x306   :  { %239 = vst.msk [vmem:[#allocation2] sm:$0xff] %vm30_vm0, %v238_v53 }
 0x307   :  { %322 = shalt.err (!%p319_p4)
}
 0x308   :  { %s323_s22 = scalar_lea.hbm %s441_s7, 128 }
 0x309   :  { %p324_p5 = scmp.ne.s32.totalorder %s441_s7, %s323_s22  ;;  %p327_p6 = scmp.lt.u32.totalorder %s323_s22, %s441_s7 }
 0x30b   :  { %p329_p7 = pnand %p327_p6, %p324_p5 }
 0x30d   :  { %332 = shalt.err (!%p329_p7)
}
 0x30e   :  { %249 = dma.vmem_to_hbm [thread:$0]  %s247_s19, 128, %s441_s7, [#allocation3]  }
 0x30f   :  { %333 = dma.done.wait [#allocation3], 128  }
 0x310   :  { %334 = vsyncadd [#allocation3], 4294967168 }
 0x311   :  { %253 = vsyncpa [#allocation3], 1 }

</bundles_post_ra>
